<compile_context>
chip_gen: v7x
topology: tpu7x:2x2x1
jax: 0.10.0
libtpu: 0.0.40
codegen_flags: <defaults>
</compile_context>

<pallas_src>
import numpy as np

import jax
import jax.numpy as jnp
from jax.experimental import pallas as pl
from jax.experimental.pallas import tpu as pltpu


def _dma_copy_kernel(x_hbm_ref, o_hbm_ref, sem):
    # Single HBM -> HBM DMA; no VMEM staging, no grid, no vector load/store work.
    cp = pltpu.make_async_copy(x_hbm_ref, o_hbm_ref, sem)
    cp.start()
    cp.wait()


def _dma_copy(x: jax.Array) -> jax.Array:
    """Whole-array HBM->HBM copy via one DMA (any shape / dtype)."""
    return pl.pallas_call(
        _dma_copy_kernel,
        out_shape=jax.ShapeDtypeStruct(x.shape, x.dtype),
        in_specs=[pl.BlockSpec(memory_space=pl.ANY)],
        out_specs=pl.BlockSpec(memory_space=pl.ANY),
        scratch_shapes=[pltpu.SemaphoreType.DMA(())],
    )(x)


def custom_embedding_forward(x: jax.Array, *, copy: bool = False) -> jax.Array:
    """Pallas equivalent of CustomEmbedding.forward.

    The reference forward() is a no-op, so the default (and optimal) path is
    to return the input unchanged with no kernel launch.  Set copy=True only
    if a physically distinct output buffer is required; that path issues a
    single HBM->HBM DMA instead of a tiled VMEM identity.
    """
    if not copy:
        # True zero-cost implementation: no kernel, no HBM traffic.
        return x
    return _dma_copy(x)


if __name__ == "__main__":
    key = jax.random.PRNGKey(0)

    # Small synthetic "embedding-like" input: batch=4, seq=16, hidden=64.
    x = jax.random.normal(key, (4, 16, 64), dtype=jnp.float32)
    x_host = jax.device_get(x)

    # Default path: no kernel at all (matches the empty forward()).
    y0 = custom_embedding_forward(x)
    jax.block_until_ready(y0)
    assert y0.shape == x.shape and y0.dtype == x.dtype
    assert np.allclose(jax.device_get(y0), x_host)

    # Copy path: single HBM->HBM DMA kernel (runs the Pallas kernel once).
    y1 = custom_embedding_forward(x, copy=True)
    jax.block_until_ready(y1)
    assert y1.shape == x.shape and y1.dtype == x.dtype
    assert np.allclose(jax.device_get(y1), x_host)

    # Odd (non-multiple-of-128) total size: previously the pathological
    # (1, total) untiled fallback; the DMA path handles it with no reshape.
    key2 = jax.random.PRNGKey(1)
    z = jax.random.normal(key2, (3, 5, 7), dtype=jnp.bfloat16)
    z_host = jax.device_get(z)
    w = custom_embedding_forward(z, copy=True)
    jax.block_until_ready(w)
    assert w.shape == z.shape and w.dtype == z.dtype
    assert np.array_equal(
        jax.device_get(w).astype(np.float32), z_host.astype(np.float32)
    )

    print("KERNEL_OK")
</pallas_src>

<mosaic_0001>
module attributes {stable_mosaic.version = 11 : i64} {
  func.func @_dma_copy_kernel(%arg0: memref<4x16x64xf32, #tpu.memory_space<any>>, %arg1: memref<4x16x64xf32, #tpu.memory_space<any>>, %arg2: memref<!tpu.dma_semaphore, #tpu.memory_space<semaphore_mem>>) attributes {dimension_semantics = [], scalar_prefetch = 0 : i64, scratch_operands = 1 : i64, tpu.core_type = #tpu.core_type<tc>} {
    tpu.enqueue_dma source(%arg0 : memref<4x16x64xf32, #tpu.memory_space<any>>) target(%arg1 : memref<4x16x64xf32, #tpu.memory_space<any>>) target_semaphore(%arg2 : memref<!tpu.dma_semaphore, #tpu.memory_space<semaphore_mem>>)
    tpu.wait_dma2 semaphore(%arg2 : memref<!tpu.dma_semaphore, #tpu.memory_space<semaphore_mem>>) src(%arg0 : memref<4x16x64xf32, #tpu.memory_space<any>>) dst(%arg1 : memref<4x16x64xf32, #tpu.memory_space<any>>)
    return
  }
}

</mosaic_0001>

<bundles_post_ra>
// kernel: tpu_custom_call.1
= control target key start
LH: loop header
LB: loop body
LE: loop exit
PB: predicated region body
PF: predicated region fallthrough
CT: control target
= control target key end

     0   :  { %s35_s6 = smov [#allocation2]   ;;  %s36_s7 = smov [#allocation3]   ;;  %s54_s0 = inlined_call_operand.hbm [shape: f32[4,16,64], index: 0, kind: input, shape index: {}]   ;;  %s55_s1 = inlined_call_operand.hbm [shape: f32[4,16,64], index: 1, kind: output, shape index: {}]  }
   0x1   :  { %s37_s8 = smov 0  }
   0x2   :  { %18 = dma.general %s54_s0, 1024, %s55_s1, %s35_s6, %s36_s7, [#allocation4], %s37_s8, 0  }
   0x3   :  { %33 = dma.done.wait [#allocation2], 1024 }
   0x4   :  { %34 = vsyncadd [#allocation2], 4294966272 }
   0x5   :  { %23 = vsyncmov [#allocation2] }
   0x8   :  { %s24_s13 = vpop.sfrf %23 }
   0x9   :  { %p29_p0 = scmp.ne.s32.totalorder %s24_s13, 0 }
   0xb   :  { %28 = shalt.err (%p29_p0)  }

</bundles_post_ra>
